<compile_context>
chip_gen: v6e
topology: v6e:2x2x1
jax: 0.10.0
libtpu: 0.0.40
codegen_flags: <defaults>
</compile_context>

<pallas_src>
import functools

import jax
import jax.numpy as jnp
from jax.experimental import pallas as pl
from jax.experimental.pallas import tpu as pltpu


def _ntxent_lse_kernel(q_ref, kt_ref, out_ref, m_ref, l_ref, *, tq, tk):
    """One (tq, tk) logits tile; online logsumexp over the key-tile axis."""
    qi = pl.program_id(0)
    ki = pl.program_id(1)
    nk = pl.num_programs(1)
    neg_big = jnp.float32(-1e30)

    @pl.when(ki == 0)
    def _init():
        m_ref[...] = jnp.full((tq, 1), neg_big, jnp.float32)
        l_ref[...] = jnp.zeros((tq, 1), jnp.float32)

    # (tq, tk) logits tile on the MXU.  Queries arrive pre-normalized with 1/T
    # folded in; keys arrive pre-normalized and pre-transposed to (d, tk), so
    # this is the MXU-native (M,K)x(K,N) contraction (no in-kernel transpose).
    s = jax.lax.dot_general(q_ref[...], kt_ref[...], (((1,), (0,)), ((), ())),
                            preferred_element_type=jnp.float32)

    def _online_update(s_tile):
        m_prev = m_ref[...]
        m_new = jnp.maximum(m_prev, jnp.max(s_tile, axis=-1, keepdims=True))
        l_ref[...] = (l_ref[...] * jnp.exp(m_prev - m_new)
                      + jnp.sum(jnp.exp(s_tile - m_new), axis=-1, keepdims=True))
        m_ref[...] = m_new

    # Self-similarity mask only where this tile straddles the global diagonal;
    # the common off-diagonal path skips the iota/compare/select entirely.
    straddles = jnp.logical_and(qi * tq < (ki + 1) * tk,
                                ki * tk < (qi + 1) * tq)

    @pl.when(straddles)
    def _masked_update():
        grow = qi * tq + jax.lax.broadcasted_iota(jnp.int32, (tq, tk), 0)
        gcol = ki * tk + jax.lax.broadcasted_iota(jnp.int32, (tq, tk), 1)
        _online_update(jnp.where(grow == gcol, neg_big, s))

    @pl.when(jnp.logical_not(straddles))
    def _plain_update():
        _online_update(s)

    # Finalize: per-row logsumexp over all j != i.  (pos_i is subtracted in
    # the wrapper, keeping the kernel output a single small lse column.)
    @pl.when(ki == nk - 1)
    def _finalize():
        out_ref[...] = m_ref[...] + jnp.log(l_ref[...])


def _divisor_tiles(total, align, cap):
    """Multiples of `align` that divide `total`, descending, capped by `cap`;
    the full extent is appended as an always-layout-legal fallback."""
    tiles = []
    t = (min(cap, total) // align) * align
    while t >= align:
        if total % t == 0:
            tiles.append(t)
        t -= align
    tiles.append(total)
    return tiles


def _pick_tiles(two_n, d, itemsize, budget_bytes):
    """D/dtype-aware tile picker.

    Mode A (preferred): resident key panel (tk == 2N) so keys are DMA'd from
    HBM exactly once and reused by every query tile.  Mode B: tiled keys with
    a large query tile, which divides the key re-streaming traffic by tq.
    """
    sub = 8 if itemsize >= 4 else (16 if itemsize == 2 else 32)

    def cost(tq, tk):
        return (2 * tk * d * itemsize        # double-buffered key window
                + 2 * tq * d * itemsize      # double-buffered query block
                + 3 * tq * tk * 4            # f32 logits + exp temporaries
                + 16 * tq * 4 + (1 << 14))   # stats scratch / output / slack

    # Mode A: resident keys.
    for tq in _divisor_tiles(two_n, sub, 256):
        if cost(tq, two_n) <= budget_bytes:
            return tq, two_n

    # Mode B: tiled keys; bias toward large tq; keep >= 2 query tiles when
    # 2N > 256 so v7x's two TensorCores both get work.
    tq_cap = 512 if d <= 256 else 256
    if two_n > 256:
        tq_cap = min(tq_cap, two_n // 2)
    tq_opts = _divisor_tiles(two_n, sub, tq_cap)
    tk_opts = _divisor_tiles(two_n, 128, 512)
    for tq in tq_opts:
        for tk in tk_opts:
            if cost(tq, tk) <= budget_bytes:
                return tq, tk
    return min(tq_opts), min(tk_opts)


def ntxent_loss(zis, zjs, *, batch_size, temperature=1.0,
                use_cosine_similarity=True, eps=1e-8,
                compute_dtype=None, tile_q=None, tile_k=None):
    """zis, zjs: (N, 1, D) as in the PyTorch module. Returns the scalar loss."""
    zi = jnp.squeeze(zis, axis=1)
    zj = jnp.squeeze(zjs, axis=1)
    assert zi.shape == zj.shape and zi.shape[0] == batch_size
    reps = jnp.concatenate([zj, zi], axis=0)       # (2N, D), module row order
    partner = jnp.concatenate([zi, zj], axis=0)    # partner[i] = reps[(i+N)%2N]
    two_n, d = reps.shape
    inv_t = jnp.float32(1.0 / temperature)

    # --- O(2N*D) prologue, hoisted out of the kernel (plain JAX / XLA). ---
    repsf = reps.astype(jnp.float32)
    partf = partner.astype(jnp.float32)
    if use_cosine_similarity:
        rn = jnp.maximum(jnp.sqrt(jnp.sum(repsf * repsf, -1, keepdims=True)), eps)
        pn = jnp.maximum(jnp.sqrt(jnp.sum(partf * partf, -1, keepdims=True)), eps)
        reps_n = repsf / rn
        part_n = partf / pn
    else:
        reps_n, part_n = repsf, partf

    # Positive term: sim[i, (i+N) mod 2N] / T -- tiny per-row dot, stays in XLA.
    pos = jnp.sum(reps_n * part_n, axis=-1) * inv_t                 # (2N,) f32

    # MXU operands: 1/T folded into the query side; keys pre-transposed to
    # (D, 2N) so the key block's last dim is lane-dense and the in-kernel
    # contraction is MXU-native.  compute_dtype=bf16 gives the fast MXU path.
    feed_dt = jnp.dtype(compute_dtype) if compute_dtype is not None else reps.dtype
    q_feed = (reps_n * inv_t).astype(feed_dt)                       # (2N, D)
    kt_feed = reps_n.astype(feed_dt).T                              # (D, 2N)

    isz = jnp.dtype(feed_dt).itemsize
    tq_auto, tk_auto = _pick_tiles(two_n, d, isz,
                                   budget_bytes=28 * 1024 * 1024)
    tq = int(tile_q) if tile_q is not None else tq_auto
    tk = int(tile_k) if tile_k is not None else tk_auto
    assert two_n % tq == 0 and two_n % tk == 0, (tq, tk, two_n)
    grid = (two_n // tq, two_n // tk)

    kernel = functools.partial(_ntxent_lse_kernel, tq=tq, tk=tk)

    lse = pl.pallas_call(
        kernel,
        out_shape=jax.ShapeDtypeStruct((two_n, 1), jnp.float32),
        grid_spec=pltpu.PrefetchScalarGridSpec(
            num_scalar_prefetch=0,
            grid=grid,
            in_specs=[pl.BlockSpec((tq, d), lambda qi, ki: (qi, 0)),   # queries
                      pl.BlockSpec((d, tk), lambda qi, ki: (0, ki))],  # keys^T
            out_specs=pl.BlockSpec((tq, 1), lambda qi, ki: (qi, 0)),
            scratch_shapes=[pltpu.VMEM((tq, 1), jnp.float32),   # running max m
                            pltpu.VMEM((tq, 1), jnp.float32)]), # running sum l
        compiler_params=pltpu.CompilerParams(
            dimension_semantics=("parallel", "arbitrary"),
            vmem_limit_bytes=40 * 1024 * 1024),
    )(q_feed, kt_feed)

    # Tiny (2N,) epilogue in plain JAX (race-free across the parallel q axis).
    return jnp.sum(lse[:, 0] - pos) / jnp.float32(two_n)


def _ntxent_loss_ref(zis, zjs, *, batch_size, temperature=1.0,
                     use_cosine_similarity=True, eps=1e-8):
    """Pure-JAX reference mirroring the PyTorch code path."""
    reps = jnp.concatenate(
        [jnp.squeeze(zjs, axis=1), jnp.squeeze(zis, axis=1)], axis=0)
    reps = reps.astype(jnp.float32)
    two_n = 2 * batch_size
    sim = reps @ reps.T
    if use_cosine_similarity:
        norm = jnp.maximum(jnp.linalg.norm(reps, axis=-1, keepdims=True), eps)
        sim = sim / (norm * norm.T)
    logits = sim / temperature
    idx = jnp.arange(two_n)
    pos = logits[idx, (idx + batch_size) % two_n]
    not_diag = ~jnp.eye(two_n, dtype=bool)
    masked = jnp.where(not_diag, logits, -jnp.inf)
    lse = jax.scipy.special.logsumexp(masked, axis=-1)
    return jnp.sum(lse - pos) / two_n


if __name__ == "__main__":
    key = jax.random.PRNGKey(0)
    k1, k2, k3, k4, k5, k6 = jax.random.split(key, 6)

    # Case 1: module-consistent small shapes (batch=4, D=32), cosine similarity.
    N1, D1 = 4, 32
    zis1 = jax.random.normal(k1, (N1, 1, D1), dtype=jnp.float32)
    zjs1 = jax.random.normal(k2, (N1, 1, D1), dtype=jnp.float32)
    out1 = jax.block_until_ready(
        ntxent_loss(zis1, zjs1, batch_size=N1, temperature=0.5,
                    use_cosine_similarity=True))
    ref1 = _ntxent_loss_ref(zis1, zjs1, batch_size=N1, temperature=0.5,
                            use_cosine_similarity=True)
    assert jnp.allclose(out1, ref1, rtol=1e-4, atol=1e-4), (out1, ref1)

    # Case 2: dot-product similarity path.
    out2 = jax.block_until_ready(
        ntxent_loss(zis1, zjs1, batch_size=N1, temperature=1.0,
                    use_cosine_similarity=False))
    ref2 = _ntxent_loss_ref(zis1, zjs1, batch_size=N1, temperature=1.0,
                            use_cosine_similarity=False)
    assert jnp.allclose(out2, ref2, rtol=1e-4, atol=1e-4), (out2, ref2)

    # Case 3: explicit tiles exercise the online-logsumexp path with multiple
    # k-steps plus both the diagonal-straddling and off-diagonal branches.
    N3, D3 = 128, 64
    zis3 = jax.random.normal(k3, (N3, 1, D3), dtype=jnp.float32)
    zjs3 = jax.random.normal(k4, (N3, 1, D3), dtype=jnp.float32)
    out3 = jax.block_until_ready(
        ntxent_loss(zis3, zjs3, batch_size=N3, temperature=0.5,
                    use_cosine_similarity=True, tile_q=64, tile_k=128))
    ref3 = _ntxent_loss_ref(zis3, zjs3, batch_size=N3, temperature=0.5,
                            use_cosine_similarity=True)
    assert jnp.allclose(out3, ref3, rtol=1e-4, atol=1e-4), (out3, ref3)

    # Case 4: default picker -> resident key panel with >1 parallel query tile.
    N4, D4 = 256, 32
    zis4 = jax.random.normal(k5, (N4, 1, D4), dtype=jnp.float32)
    zjs4 = jax.random.normal(k6, (N4, 1, D4), dtype=jnp.float32)
    out4 = jax.block_until_ready(
        ntxent_loss(zis4, zjs4, batch_size=N4, temperature=0.5,
                    use_cosine_similarity=True))
    ref4 = _ntxent_loss_ref(zis4, zjs4, batch_size=N4, temperature=0.5,
                            use_cosine_similarity=True)
    assert jnp.allclose(out4, ref4, rtol=1e-4, atol=1e-4), (out4, ref4)

    # Case 5: bf16 MXU-operand fast path (loss-level accuracy, loose tolerance).
    out5 = jax.block_until_ready(
        ntxent_loss(zis4, zjs4, batch_size=N4, temperature=0.5,
                    use_cosine_similarity=True, compute_dtype=jnp.bfloat16))
    assert jnp.allclose(out5, ref4, rtol=1e-1, atol=1e-1), (out5, ref4)

    print("KERNEL_OK")
</pallas_src>

<mosaic_0001>
module attributes {stable_mosaic.version = 11 : i64} {
  func.func @_ntxent_lse_kernel(%arg0: i32, %arg1: i32, %arg2: memref<8x32xf32, #tpu.memory_space<vmem>>, %arg3: memref<32x8xf32, #tpu.memory_space<vmem>>, %arg4: memref<8x1xf32, #tpu.memory_space<vmem>>, %arg5: memref<8x1xf32, #tpu.memory_space<vmem>>, %arg6: memref<8x1xf32, #tpu.memory_space<vmem>>) attributes {dimension_semantics = [#tpu.dimension_semantics<parallel>, #tpu.dimension_semantics<arbitrary>], iteration_bounds = array<i64: 1, 1>, scalar_prefetch = 0 : i64, scratch_operands = 2 : i64, tpu.core_type = #tpu.core_type<tc>, window_params = [{transform_indices = @transform_0, window_bounds = array<i64: 8, 32>}, {transform_indices = @transform_1, window_bounds = array<i64: 32, 8>}, {transform_indices = @transform_2, window_bounds = array<i64: 8, 1>}]} {
    %c0_i32 = arith.constant 0 : i32
    %0 = arith.cmpi eq, %arg1, %c0_i32 : i32
    %1 = arith.extui %0 : i1 to i32
    %cst = arith.constant -1.000000e+30 : f32
    %c0_i32_0 = arith.constant 0 : i32
    %2 = arith.cmpi ne, %1, %c0_i32_0 : i32
    scf.if %2 {
      %23 = vector.broadcast %cst : f32 to vector<8x1xf32>
      %c0_14 = arith.constant 0 : index
      %c0_15 = arith.constant 0 : index
      %24 = vector.load %arg5[%c0_14, %c0_15] : memref<8x1xf32, #tpu.memory_space<vmem>>, vector<8x1xf32>
      tpu.vector_store %arg5[%c0_14, %c0_15], %23 {strides = array<i32>} : memref<8x1xf32, #tpu.memory_space<vmem>>, vector<8x1xf32>,
      %cst_16 = arith.constant 0.000000e+00 : f32
      %25 = vector.broadcast %cst_16 : f32 to vector<8x1xf32>
      %c0_17 = arith.constant 0 : index
      %c0_18 = arith.constant 0 : index
      %26 = vector.load %arg6[%c0_17, %c0_18] : memref<8x1xf32, #tpu.memory_space<vmem>>, vector<8x1xf32>
      tpu.vector_store %arg6[%c0_17, %c0_18], %25 {strides = array<i32>} : memref<8x1xf32, #tpu.memory_space<vmem>>, vector<8x1xf32>,
    } else {
    }
    %c0 = arith.constant 0 : index
    %c0_1 = arith.constant 0 : index
    %3 = vector.load %arg2[%c0, %c0_1] : memref<8x32xf32, #tpu.memory_space<vmem>>, vector<8x32xf32>
    %c0_2 = arith.constant 0 : index
    %c0_3 = arith.constant 0 : index
    %4 = vector.load %arg3[%c0_2, %c0_3] : memref<32x8xf32, #tpu.memory_space<vmem>>, vector<32x8xf32>
    %cst_4 = arith.constant dense<0.000000e+00> : vector<8x8xf32>
    %5 = tpu.matmul %3, %4, %cst_4 {dimension_numbers = #tpu.dot_dimension_numbers<[1], [0], [0], [1], [0, 0, 1, 1], [], []>} : vector<8x32xf32>, vector<32x8xf32>, vector<8x8xf32> -> vector<8x8xf32>
    %c8_i32 = arith.constant 8 : i32
    %6 = arith.muli %arg0, %c8_i32 : i32
    %c1_i32 = arith.constant 1 : i32
    %7 = arith.addi %arg1, %c1_i32 : i32
    %c8_i32_5 = arith.constant 8 : i32
    %8 = arith.muli %7, %c8_i32_5 : i32
    %9 = arith.cmpi slt, %6, %8 : i32
    %c8_i32_6 = arith.constant 8 : i32
    %10 = arith.muli %arg1, %c8_i32_6 : i32
    %c1_i32_7 = arith.constant 1 : i32
    %11 = arith.addi %arg0, %c1_i32_7 : i32
    %c8_i32_8 = arith.constant 8 : i32
    %12 = arith.muli %11, %c8_i32_8 : i32
    %13 = arith.cmpi slt, %10, %12 : i32
    %14 = arith.andi %9, %13 : i1
    %15 = arith.extui %14 : i1 to i32
    %cst_9 = arith.constant -1.000000e+30 : f32
    %c0_i32_10 = arith.constant 0 : i32
    %16 = arith.cmpi ne, %15, %c0_i32_10 : i32
    scf.if %16 {
      %c8_i32_14 = arith.constant 8 : i32
      %23 = arith.muli %arg0, %c8_i32_14 : i32
      %24 = tpu.iota {dimensions = array<i32: 0>} : vector<8x8xi32>
      %25 = vector.broadcast %23 : i32 to vector<8x8xi32>
      %26 = arith.addi %25, %24 : vector<8x8xi32>
      %c8_i32_15 = arith.constant 8 : i32
      %27 = arith.muli %arg1, %c8_i32_15 : i32
      %28 = tpu.iota {dimensions = array<i32: 1>} : vector<8x8xi32>
      %29 = vector.broadcast %27 : i32 to vector<8x8xi32>
      %30 = arith.addi %29, %28 : vector<8x8xi32>
      %31 = arith.cmpi eq, %26, %30 : vector<8x8xi32>
      %32 = vector.broadcast %cst_9 : f32 to vector<8x8xf32>
      %33 = arith.select %31, %32, %5 : vector<8x8xi1>, vector<8x8xf32>
      %c0_16 = arith.constant 0 : index
      %c0_17 = arith.constant 0 : index
      %34 = vector.load %arg5[%c0_16, %c0_17] : memref<8x1xf32, #tpu.memory_space<vmem>>, vector<8x1xf32>
      %cst_18 = arith.constant dense<0xFF800000> : vector<8xf32>
      %35 = vector.multi_reduction <maximumf>, %33, %cst_18 [1] : vector<8x8xf32> to vector<8xf32>
      %36 = vector.shape_cast %35 : vector<8xf32> to vector<8x1xf32>
      %37 = arith.maximumf %34, %36 : vector<8x1xf32>
      %c0_19 = arith.constant 0 : index
      %c0_20 = arith.constant 0 : index
      %38 = vector.load %arg6[%c0_19, %c0_20] : memref<8x1xf32, #tpu.memory_space<vmem>>, vector<8x1xf32>
      %39 = arith.subf %34, %37 : vector<8x1xf32>
      %40 = math.exp %39 : vector<8x1xf32>
      %41 = arith.mulf %38, %40 : vector<8x1xf32>
      %42 = vector.broadcast %37 : vector<8x1xf32> to vector<8x8xf32>
      %43 = arith.subf %33, %42 : vector<8x8xf32>
      %44 = math.exp %43 : vector<8x8xf32>
      %cst_21 = arith.constant dense<0.000000e+00> : vector<8xf32>
      %45 = vector.multi_reduction <add>, %44, %cst_21 [1] : vector<8x8xf32> to vector<8xf32>
      %46 = vector.shape_cast %45 : vector<8xf32> to vector<8x1xf32>
      %47 = arith.addf %41, %46 : vector<8x1xf32>
      %c0_22 = arith.constant 0 : index
      %c0_23 = arith.constant 0 : index
      %48 = vector.load %arg6[%c0_22, %c0_23] : memref<8x1xf32, #tpu.memory_space<vmem>>, vector<8x1xf32>
      tpu.vector_store %arg6[%c0_22, %c0_23], %47 {strides = array<i32>} : memref<8x1xf32, #tpu.memory_space<vmem>>, vector<8x1xf32>,
      %c0_24 = arith.constant 0 : index
      %c0_25 = arith.constant 0 : index
      %49 = vector.load %arg5[%c0_24, %c0_25] : memref<8x1xf32, #tpu.memory_space<vmem>>, vector<8x1xf32>
      tpu.vector_store %arg5[%c0_24, %c0_25], %37 {strides = array<i32>} : memref<8x1xf32, #tpu.memory_space<vmem>>, vector<8x1xf32>,
    } else {
    }
    %true = arith.constant true
    %17 = arith.xori %14, %true : i1
    %18 = arith.extui %17 : i1 to i32
    %c0_i32_11 = arith.constant 0 : i32
    %19 = arith.cmpi ne, %18, %c0_i32_11 : i32
    scf.if %19 {
      %c0_14 = arith.constant 0 : index
      %c0_15 = arith.constant 0 : index
      %23 = vector.load %arg5[%c0_14, %c0_15] : memref<8x1xf32, #tpu.memory_space<vmem>>, vector<8x1xf32>
      %cst_16 = arith.constant dense<0xFF800000> : vector<8xf32>
      %24 = vector.multi_reduction <maximumf>, %5, %cst_16 [1] : vector<8x8xf32> to vector<8xf32>
      %25 = vector.shape_cast %24 : vector<8xf32> to vector<8x1xf32>
      %26 = arith.maximumf %23, %25 : vector<8x1xf32>
      %c0_17 = arith.constant 0 : index
      %c0_18 = arith.constant 0 : index
      %27 = vector.load %arg6[%c0_17, %c0_18] : memref<8x1xf32, #tpu.memory_space<vmem>>, vector<8x1xf32>
      %28 = arith.subf %23, %26 : vector<8x1xf32>
      %29 = math.exp %28 : vector<8x1xf32>
      %30 = arith.mulf %27, %29 : vector<8x1xf32>
      %31 = vector.broadcast %26 : vector<8x1xf32> to vector<8x8xf32>
      %32 = arith.subf %5, %31 : vector<8x8xf32>
      %33 = math.exp %32 : vector<8x8xf32>
      %cst_19 = arith.constant dense<0.000000e+00> : vector<8xf32>
      %34 = vector.multi_reduction <add>, %33, %cst_19 [1] : vector<8x8xf32> to vector<8xf32>
      %35 = vector.shape_cast %34 : vector<8xf32> to vector<8x1xf32>
      %36 = arith.addf %30, %35 : vector<8x1xf32>
      %c0_20 = arith.constant 0 : index
      %c0_21 = arith.constant 0 : index
      %37 = vector.load %arg6[%c0_20, %c0_21] : memref<8x1xf32, #tpu.memory_space<vmem>>, vector<8x1xf32>
      tpu.vector_store %arg6[%c0_20, %c0_21], %36 {strides = array<i32>} : memref<8x1xf32, #tpu.memory_space<vmem>>, vector<8x1xf32>,
      %c0_22 = arith.constant 0 : index
      %c0_23 = arith.constant 0 : index
      %38 = vector.load %arg5[%c0_22, %c0_23] : memref<8x1xf32, #tpu.memory_space<vmem>>, vector<8x1xf32>
      tpu.vector_store %arg5[%c0_22, %c0_23], %26 {strides = array<i32>} : memref<8x1xf32, #tpu.memory_space<vmem>>, vector<8x1xf32>,
    } else {
    }
    %c0_i32_12 = arith.constant 0 : i32
    %20 = arith.cmpi eq, %arg1, %c0_i32_12 : i32
    %21 = arith.extui %20 : i1 to i32
    %c0_i32_13 = arith.constant 0 : i32
    %22 = arith.cmpi ne, %21, %c0_i32_13 : i32
    scf.if %22 {
      %c0_14 = arith.constant 0 : index
      %c0_15 = arith.constant 0 : index
      %23 = vector.load %arg5[%c0_14, %c0_15] : memref<8x1xf32, #tpu.memory_space<vmem>>, vector<8x1xf32>
      %c0_16 = arith.constant 0 : index
      %c0_17 = arith.constant 0 : index
      %24 = vector.load %arg6[%c0_16, %c0_17] : memref<8x1xf32, #tpu.memory_space<vmem>>, vector<8x1xf32>
      %25 = math.log %24 : vector<8x1xf32>
      %26 = arith.addf %23, %25 : vector<8x1xf32>
      %c0_18 = arith.constant 0 : index
      %c0_19 = arith.constant 0 : index
      %27 = vector.load %arg4[%c0_18, %c0_19] : memref<8x1xf32, #tpu.memory_space<vmem>>, vector<8x1xf32>
      tpu.vector_store %arg4[%c0_18, %c0_19], %26 {strides = array<i32>} : memref<8x1xf32, #tpu.memory_space<vmem>>, vector<8x1xf32>,
    } else {
    }
    return
  }
  func.func @transform_0(%arg0: i32, %arg1: i32) -> (i32, i32) {
    %c0_i32 = arith.constant 0 : i32
    %c0_i32_0 = arith.constant 0 : i32
    return %arg0, %c0_i32 : i32, i32
  }
  func.func @transform_1(%arg0: i32, %arg1: i32) -> (i32, i32) {
    %c0_i32 = arith.constant 0 : i32
    %c0_i32_0 = arith.constant 0 : i32
    return %c0_i32, %arg1 : i32, i32
  }
  func.func @transform_2(%arg0: i32, %arg1: i32) -> (i32, i32) {
    %c0_i32 = arith.constant 0 : i32
    %c0_i32_0 = arith.constant 0 : i32
    return %arg0, %c0_i32 : i32, i32
  }
}

</mosaic_0001>

<bundles_post_ra>
// kernel: tpu_custom_call.1
= control target key start
LH: loop header
LB: loop body
LE: loop exit
PB: predicated region body
PF: predicated region fallthrough
CT: control target
= control target key end

     0   :  { %v216_v0 = vmov 0.0   ;;  %vm217_vm0 = vmmov 0   ;;  %vm23_vm1 = vcmask 261120   ;;  %vm15_vm2 = vcmask 7168   ;;  %s260_s1 = inlined_call_operand.vmem [shape: f32[32,8], index: 1, kind: input, shape index: {}]   ;;  %s261_s0 = inlined_call_operand.vmem [shape: f32[8,32], index: 0, kind: input, shape index: {}]   ;;  %s262_s2 = inlined_call_operand.vmem [shape: f32[8,1], index: 2, kind: output, shape index: {}]  }
   0x1   :  { %194 = vmatprep.subr.mxu0 %v216_v0  ;;  %v22_v1 = vld [vmem:[%s260_s1 + $0x18] sm:$0xff]  ;;  %v21_v2 = vld [vmem:[%s260_s1 + $0x10] sm:$0xff]  ;;  %202 = vmatprep.mubr.msk.f32.mxu0 %vm217_vm0, %v216_v0  ;;  %v20_v3 = vld [vmem:[%s260_s1 + $0x8] sm:$0xff]  ;;  %v218_v6 = vmov -1e+30   ;;  %17 = vst.msk [vmem:[#allocation3] sm:$0xff] %vm15_vm2, %v216_v0  ;;  %v109_v7 = vlaneseq }
   0x2   :  { %195 = vmatpush3.msra.mxu0 %v22_v1  ;;  %v19_v4 = vld [vmem:[%s260_s1] sm:$0xff]  ;;  %16 = vst.msk [vmem:[#allocation2] sm:$0xff] %vm15_vm2, %v218_v6  ;;  %vm120_vm4 = vcmask 64512   ;;  %v219_v14 = vmov 0  }
   0x3   :  { %196 = vmatprep.subr.mxu0 %v216_v0  ;;  %v18_v5 = vld [vmem:[%s261_s0] sm:$0xff]  ;;  %v110_v8 = vshrl.u32 %v109_v7, 7  ;;  %v114_v9 = vand.u32 127, %v109_v7  ;;  %209 = vset.pattern.permute.xlu0 %v219_v14 }
   0x4   :  { %197 = vmatpush3.msra.mxu0 %v21_v2 }
   0x5   :  { %198 = vmatprep.subr.mxu0 %v216_v0  ;;  %vm117_vm3 = vcmp.eq.s32.totalorder %v110_v8, %v114_v9 }
   0x6   :  { %199 = vmatpush3.msra.mxu0 %v20_v3 }
   0x7   :  { %200 = vmatprep.subr.mxu0 %v216_v0 }
   0x8   :  { %201 = vmatpush3.msra.mxu0 %v19_v4  ;;  %v125_v26 = vld [vmem:[#allocation3] sm:$0xff] }
   0x9   :  { %203 = vmatmul.mubr.msk.f32.vlgmr.msra.gmra.mxu0 %vm23_vm1, %v18_v5  ;;  %v119_v15 = vld [vmem:[#allocation2] sm:$0xff] }
  0xc9   :  { %v93_v10 = vpop.f32.mrf.mxu0 }
  0xca   :  { %v118_v11 = vsel %vm117_vm3, -1e+30, %v93_v10 }
  0xcb   :  { %v204_v12 = vpop.f32.mrf.mxu0  ;;  %v121_v13 = vsel %vm120_vm4, %v118_v11, -inf }
  0xcc   :  { %122 = vmax.xlane.f32.xlu0 %v121_v13 }
 0x155   :  { %v123_v16 = vpop.xlane.xlu0 %122 }
 0x156   :  { %v124_v17 = vmax.f32 %v119_v15, %v123_v16 }
 0x158   :  { %v126_v18 = vsub.f32 %v119_v15, %v124_v17  ;;  %144 = vst.msk [vmem:[#allocation2] sm:$0xff] %vm15_vm2, %v124_v17  ;;  %132 = vperm.xlu0 %209, %v124_v17  }
 0x15a   :  { %v127_v24 = vmul.f32 1.442695, %v126_v18 }
 0x15f   :  { %v177_v33 = vld [vmem:[#allocation2] sm:$0xff] }
 0x1d3   :  { %v133_v19 = vpop.permute.xlu0 %132 }
 0x1d4   :  { %v135_v20 = vsub.f32 %v118_v11, %v133_v19 }
 0x1d6   :  { %v136_v21 = vmul.f32 1.442695, %v135_v20 }
 0x1d8   :  { %210 = vpow2.f32 %v136_v21 }
 0x1d9   :  { %212 = vpow2.f32 %v127_v24 }
 0x1e5   :  { %v211_v22 = vpop.eup %210 }
 0x1e6   :  { %v138_v23 = vsel %vm120_vm4, %v211_v22, 0.0  ;;  %v213_v25 = vpop.eup %212 }
 0x1e7   :  { %139 = vadd.xlane.f32.xlu1 %v138_v23  ;;  %v129_v27 = vmul.f32 %v213_v25, %v125_v26 }
 0x270   :  { %v140_v28 = vpop.xlane.xlu1 %139 }
 0x271   :  { %v141_v29 = vadd.f32 %v140_v28, %v129_v27 }
 0x273   :  { %143 = vst.msk [vmem:[#allocation3] sm:$0xff] %vm15_vm2, %v141_v29 }
 0x27a   :  { %v178_v30 = vld [vmem:[#allocation3] sm:$0xff] }
 0x27b   :  { %214 = vlog2.f32 %v178_v30 }
 0x288   :  { %v215_v31 = vpop.eup %214 }
 0x289   :  { %v180_v32 = vmul.f32 0.6931472, %v215_v31 }
 0x28b   :  { %v181_v34 = vadd.f32 %v180_v32, %v177_v33 }
 0x28d   :  { %183 = vst.msk [vmem:[%s262_s2] sm:$0xff] %vm15_vm2, %v181_v34 }

</bundles_post_ra>
